<compile_context>
chip_gen: v7x
topology: tpu7x:2x2x1
jax: 0.10.0
libtpu: 0.0.40
codegen_flags: <defaults>
</compile_context>

<pallas_src>
import numpy as np

import jax
import jax.numpy as jnp
from jax.experimental import pallas as pl
from jax.experimental.pallas import tpu as pltpu

EPS = 1e-5


def _double_conv_kernel(x_ref, a1_ref, a2_ref, s0_ref, s2_ref,
                        t_ref, tt_ref, g1_ref, bt1_ref, g2_ref, bt2_ref,
                        o_ref):
    # x_ref  : (N*H, W*Cin)        lane-packed input rows
    # a1_ref : (3, W*Cin,  W*Cout) banded conv1 weights (one slab per dh)
    # a2_ref : (3, W*Cout, W*Cout) banded conv2 weights
    # s0_ref : (N*H, N*H)          "use row h-1" shift matrix (zero at h==0)
    # s2_ref : (N*H, N*H)          "use row h+1" shift matrix (zero at h==H-1)
    # t_ref  : (W*Cout, Cout)      per-channel gather:   lanes (w,c) -> c
    # tt_ref : (Cout, W*Cout)      per-channel scatter:  c -> lanes (w,c)
    # g*/bt* : (1, Cout)           BN gamma / beta
    # o_ref  : (N*H, W*Cout)       lane-dense output slab
    NH = x_ref.shape[0]
    WCout = o_ref.shape[-1]
    Cout = t_ref.shape[-1]
    W = WCout // Cout
    inv_m = 1.0 / float(NH * W)          # BN sample count = N*H*W

    s0 = s0_ref[...]
    s2 = s2_ref[...]
    t = t_ref[...]
    tt = tt_ref[...]

    def conv_bn_relu(z, a_ref, gamma, beta):
        # --- 3x3 conv as 3 banded matmuls (one per kernel row) ---
        p0 = jnp.dot(z, a_ref[0], preferred_element_type=jnp.float32)
        p1 = jnp.dot(z, a_ref[1], preferred_element_type=jnp.float32)
        p2 = jnp.dot(z, a_ref[2], preferred_element_type=jnp.float32)
        acc = (p1
               + jnp.dot(s0, p0, preferred_element_type=jnp.float32)
               + jnp.dot(s2, p2, preferred_element_type=jnp.float32))
        # --- train-mode BN: one pass for stats (sum & sum-of-squares) ---
        # (conv bias is folded out: it cancels exactly in (x - mean))
        s_wc = jnp.sum(acc, axis=0, keepdims=True)         # (1, W*Cout)
        q_wc = jnp.sum(acc * acc, axis=0, keepdims=True)   # (1, W*Cout)
        s_c = jnp.dot(s_wc, t, preferred_element_type=jnp.float32)   # (1, Cout)
        q_c = jnp.dot(q_wc, t, preferred_element_type=jnp.float32)   # (1, Cout)
        mean = s_c * inv_m
        var = q_c * inv_m - mean * mean                    # biased variance
        scale = gamma * jax.lax.rsqrt(var + EPS)           # (1, Cout)
        shift = beta - mean * scale
        scale_wc = jnp.dot(scale, tt, preferred_element_type=jnp.float32)
        shift_wc = jnp.dot(shift, tt, preferred_element_type=jnp.float32)
        # --- normalize + ReLU on lane-dense (N*H, W*Cout) tiles ---
        return jnp.maximum(acc * scale_wc + shift_wc, 0.0)

    y1 = conv_bn_relu(x_ref[...], a1_ref, g1_ref[...], bt1_ref[...])
    y2 = conv_bn_relu(y1, a2_ref, g2_ref[...], bt2_ref[...])
    o_ref[...] = y2.astype(o_ref.dtype)                    # unmasked 128-lane store


def _banded_weights(w_hwio, W):
    """(3,3,Cin,Cout) HWIO -> (3, W*Cin, W*Cout) block-banded matrices.

    A[dh][wi*Cin+ci, w*Cout+c] = w[dh, wi-w+1, ci, c] when |wi-w| <= 1 else 0,
    i.e. the padding=1 W-boundary is built into the band structure.
    """
    slabs = []
    for dh in range(3):
        blocks = [
            jnp.kron(jnp.asarray(np.eye(W, k=-(dw - 1), dtype=np.float32)),
                     w_hwio[dh, dw])
            for dw in range(3)
        ]
        slabs.append(blocks[0] + blocks[1] + blocks[2])
    return jnp.stack(slabs, axis=0)


def _static_mats(N, H, W, Cout):
    """Static (numpy) shift / channel-tiling matrices."""
    s0 = np.kron(np.eye(N, dtype=np.float32),
                 np.eye(H, k=-1, dtype=np.float32))   # out row h <- row h-1
    s2 = np.kron(np.eye(N, dtype=np.float32),
                 np.eye(H, k=+1, dtype=np.float32))   # out row h <- row h+1
    t = np.kron(np.ones((W, 1), np.float32),
                np.eye(Cout, dtype=np.float32))        # (W*Cout, Cout)
    tt = np.ascontiguousarray(t.T)                     # (Cout, W*Cout)
    return (jnp.asarray(s0), jnp.asarray(s2), jnp.asarray(t), jnp.asarray(tt))


def double_conv(x_nchw, params):
    """x_nchw: (N, Cin, H, W) float32 -> (N, Cout, H, W) float32."""
    w1, b1, g1, bt1, w2, b2, g2, bt2 = params
    del b1, b2  # conv biases cancel exactly under batch-stat BatchNorm
    N, Cin, H, W = x_nchw.shape
    Cout = w1.shape[-1]

    # NCHW -> lane-packed rows: row (n,h), lane (w*Cin + ci)
    x_rows = jnp.transpose(x_nchw, (0, 2, 3, 1)).reshape(N * H, W * Cin)

    a1 = _banded_weights(w1, W)            # (3, W*Cin,  W*Cout)
    a2 = _banded_weights(w2, W)            # (3, W*Cout, W*Cout)
    s0, s2, t, tt = _static_mats(N, H, W, Cout)

    def full_spec(arr):
        nd = arr.ndim
        return pl.BlockSpec(arr.shape, lambda i, _nd=nd: (0,) * _nd)

    inputs = (x_rows, a1, a2, s0, s2, t, tt, g1, bt1, g2, bt2)

    out2d = pl.pallas_call(
        _double_conv_kernel,
        out_shape=jax.ShapeDtypeStruct((N * H, W * Cout), jnp.float32),
        grid=(1,),
        in_specs=[full_spec(a) for a in inputs],
        out_specs=pl.BlockSpec((N * H, W * Cout), lambda i: (0, 0)),
        compiler_params=pltpu.CompilerParams(
            dimension_semantics=("arbitrary",),
            vmem_limit_bytes=32 * 1024 * 1024),
    )(*inputs)

    # lane-dense slab -> NHWC -> NCHW (free layout plumbing in the wrapper)
    return jnp.transpose(out2d.reshape(N, H, W, Cout), (0, 3, 1, 2))


def double_conv_reference(x_nchw, params):
    """Pure-JAX reference (with conv biases) for validation."""
    w1, b1, g1, bt1, w2, b2, g2, bt2 = params
    x = jnp.transpose(x_nchw, (0, 2, 3, 1))

    def conv(x, w, b):
        y = jax.lax.conv_general_dilated(
            x, w, window_strides=(1, 1), padding="SAME",
            dimension_numbers=("NHWC", "HWIO", "NHWC"))
        return y + b.reshape(1, 1, 1, -1)

    def bn_relu(x, g, bt):
        mean = jnp.mean(x, axis=(0, 1, 2), keepdims=True)
        var = jnp.mean((x - mean) ** 2, axis=(0, 1, 2), keepdims=True)
        y = (x - mean) * jax.lax.rsqrt(var + EPS)
        y = y * g.reshape(1, 1, 1, -1) + bt.reshape(1, 1, 1, -1)
        return jnp.maximum(y, 0.0)

    y = bn_relu(conv(x, w1, b1), g1, bt1)
    y = bn_relu(conv(y, w2, b2), g2, bt2)
    return jnp.transpose(y, (0, 3, 1, 2))


def init_params(key, in_ch, out_ch):
    ks = jax.random.split(key, 8)
    w1 = 0.1 * jax.random.normal(ks[0], (3, 3, in_ch, out_ch), jnp.float32)
    b1 = 0.1 * jax.random.normal(ks[1], (1, out_ch), jnp.float32)
    g1 = 1.0 + 0.1 * jax.random.normal(ks[2], (1, out_ch), jnp.float32)
    bt1 = 0.1 * jax.random.normal(ks[3], (1, out_ch), jnp.float32)
    w2 = 0.1 * jax.random.normal(ks[4], (3, 3, out_ch, out_ch), jnp.float32)
    b2 = 0.1 * jax.random.normal(ks[5], (1, out_ch), jnp.float32)
    g2 = 1.0 + 0.1 * jax.random.normal(ks[6], (1, out_ch), jnp.float32)
    bt2 = 0.1 * jax.random.normal(ks[7], (1, out_ch), jnp.float32)
    return (w1, b1, g1, bt1, w2, b2, g2, bt2)


if __name__ == "__main__":
    N, Cin, Cout, H, W = 2, 4, 8, 16, 16
    key = jax.random.PRNGKey(0)
    k_x, k_p = jax.random.split(key)
    x = jax.random.normal(k_x, (N, Cin, H, W), jnp.float32)
    params = init_params(k_p, Cin, Cout)

    out = jax.block_until_ready(double_conv(x, params))
    ref = jax.block_until_ready(double_conv_reference(x, params))

    assert out.shape == (N, Cout, H, W), out.shape
    assert jnp.allclose(out, ref, rtol=1e-4, atol=1e-4), (
        float(jnp.max(jnp.abs(out - ref))))
    print("KERNEL_OK")
</pallas_src>

<mosaic_0001>
module attributes {stable_mosaic.version = 11 : i64} {
  func.func @_double_conv_kernel(%arg0: i32, %arg1: memref<32x64xf32, #tpu.memory_space<vmem>>, %arg2: memref<3x64x128xf32, #tpu.memory_space<vmem>>, %arg3: memref<3x128x128xf32, #tpu.memory_space<vmem>>, %arg4: memref<32x32xf32, #tpu.memory_space<vmem>>, %arg5: memref<32x32xf32, #tpu.memory_space<vmem>>, %arg6: memref<128x8xf32, #tpu.memory_space<vmem>>, %arg7: memref<8x128xf32, #tpu.memory_space<vmem>>, %arg8: memref<1x8xf32, #tpu.memory_space<vmem>>, %arg9: memref<1x8xf32, #tpu.memory_space<vmem>>, %arg10: memref<1x8xf32, #tpu.memory_space<vmem>>, %arg11: memref<1x8xf32, #tpu.memory_space<vmem>>, %arg12: memref<32x128xf32, #tpu.memory_space<vmem>>) attributes {dimension_semantics = [#tpu.dimension_semantics<arbitrary>], iteration_bounds = array<i64: 1>, scalar_prefetch = 0 : i64, scratch_operands = 0 : i64, tpu.core_type = #tpu.core_type<tc>, window_params = [{pipeline_mode = #tpu.pipeline_mode<synchronous>, transform_indices = @transform_0, window_bounds = array<i64: 32, 64>}, {pipeline_mode = #tpu.pipeline_mode<synchronous>, transform_indices = @transform_1, window_bounds = array<i64: 3, 64, 128>}, {pipeline_mode = #tpu.pipeline_mode<synchronous>, transform_indices = @transform_2, window_bounds = array<i64: 3, 128, 128>}, {pipeline_mode = #tpu.pipeline_mode<synchronous>, transform_indices = @transform_3, window_bounds = array<i64: 32, 32>}, {pipeline_mode = #tpu.pipeline_mode<synchronous>, transform_indices = @transform_4, window_bounds = array<i64: 32, 32>}, {pipeline_mode = #tpu.pipeline_mode<synchronous>, transform_indices = @transform_5, window_bounds = array<i64: 128, 8>}, {pipeline_mode = #tpu.pipeline_mode<synchronous>, transform_indices = @transform_6, window_bounds = array<i64: 8, 128>}, {pipeline_mode = #tpu.pipeline_mode<synchronous>, transform_indices = @transform_7, window_bounds = array<i64: 1, 8>}, {pipeline_mode = #tpu.pipeline_mode<synchronous>, transform_indices = @transform_8, window_bounds = array<i64: 1, 8>}, {pipeline_mode = #tpu.pipeline_mode<synchronous>, transform_indices = @transform_9, window_bounds = array<i64: 1, 8>}, {pipeline_mode = #tpu.pipeline_mode<synchronous>, transform_indices = @transform_10, window_bounds = array<i64: 1, 8>}, {pipeline_mode = #tpu.pipeline_mode<synchronous>, transform_indices = @transform_11, window_bounds = array<i64: 32, 128>}]} {
    %c0 = arith.constant 0 : index
    %c0_0 = arith.constant 0 : index
    %0 = vector.load %arg4[%c0, %c0_0] : memref<32x32xf32, #tpu.memory_space<vmem>>, vector<32x32xf32>
    %c0_1 = arith.constant 0 : index
    %c0_2 = arith.constant 0 : index
    %1 = vector.load %arg5[%c0_1, %c0_2] : memref<32x32xf32, #tpu.memory_space<vmem>>, vector<32x32xf32>
    %c0_3 = arith.constant 0 : index
    %c0_4 = arith.constant 0 : index
    %2 = vector.load %arg6[%c0_3, %c0_4] : memref<128x8xf32, #tpu.memory_space<vmem>>, vector<128x8xf32>
    %c0_5 = arith.constant 0 : index
    %c0_6 = arith.constant 0 : index
    %3 = vector.load %arg7[%c0_5, %c0_6] : memref<8x128xf32, #tpu.memory_space<vmem>>, vector<8x128xf32>
    %c0_7 = arith.constant 0 : index
    %c0_8 = arith.constant 0 : index
    %4 = vector.load %arg1[%c0_7, %c0_8] : memref<32x64xf32, #tpu.memory_space<vmem>>, vector<32x64xf32>
    %c0_9 = arith.constant 0 : index
    %c0_10 = arith.constant 0 : index
    %5 = vector.load %arg8[%c0_9, %c0_10] : memref<1x8xf32, #tpu.memory_space<vmem>>, vector<1x8xf32>
    %c0_11 = arith.constant 0 : index
    %c0_12 = arith.constant 0 : index
    %6 = vector.load %arg9[%c0_11, %c0_12] : memref<1x8xf32, #tpu.memory_space<vmem>>, vector<1x8xf32>
    %c0_13 = arith.constant 0 : index
    %c0_14 = arith.constant 0 : index
    %c0_15 = arith.constant 0 : index
    %7 = vector.load %arg2[%c0_13, %c0_14, %c0_15] : memref<3x64x128xf32, #tpu.memory_space<vmem>>, vector<1x64x128xf32>
    %8 = vector.shape_cast %7 : vector<1x64x128xf32> to vector<64x128xf32>
    %cst = arith.constant dense<0.000000e+00> : vector<32x128xf32>
    %9 = tpu.matmul %4, %8, %cst {dimension_numbers = #tpu.dot_dimension_numbers<[1], [0], [0], [1], [0, 0, 1, 1], [], []>} : vector<32x64xf32>, vector<64x128xf32>, vector<32x128xf32> -> vector<32x128xf32>
    %c1 = arith.constant 1 : index
    %c0_16 = arith.constant 0 : index
    %c0_17 = arith.constant 0 : index
    %10 = vector.load %arg2[%c1, %c0_16, %c0_17] : memref<3x64x128xf32, #tpu.memory_space<vmem>>, vector<1x64x128xf32>
    %11 = vector.shape_cast %10 : vector<1x64x128xf32> to vector<64x128xf32>
    %cst_18 = arith.constant dense<0.000000e+00> : vector<32x128xf32>
    %12 = tpu.matmul %4, %11, %cst_18 {dimension_numbers = #tpu.dot_dimension_numbers<[1], [0], [0], [1], [0, 0, 1, 1], [], []>} : vector<32x64xf32>, vector<64x128xf32>, vector<32x128xf32> -> vector<32x128xf32>
    %c2 = arith.constant 2 : index
    %c0_19 = arith.constant 0 : index
    %c0_20 = arith.constant 0 : index
    %13 = vector.load %arg2[%c2, %c0_19, %c0_20] : memref<3x64x128xf32, #tpu.memory_space<vmem>>, vector<1x64x128xf32>
    %14 = vector.shape_cast %13 : vector<1x64x128xf32> to vector<64x128xf32>
    %cst_21 = arith.constant dense<0.000000e+00> : vector<32x128xf32>
    %15 = tpu.matmul %4, %14, %cst_21 {dimension_numbers = #tpu.dot_dimension_numbers<[1], [0], [0], [1], [0, 0, 1, 1], [], []>} : vector<32x64xf32>, vector<64x128xf32>, vector<32x128xf32> -> vector<32x128xf32>
    %cst_22 = arith.constant dense<0.000000e+00> : vector<32x128xf32>
    %16 = tpu.matmul %0, %9, %cst_22 {dimension_numbers = #tpu.dot_dimension_numbers<[1], [0], [0], [1], [0, 0, 1, 1], [], []>} : vector<32x32xf32>, vector<32x128xf32>, vector<32x128xf32> -> vector<32x128xf32>
    %17 = arith.addf %12, %16 : vector<32x128xf32>
    %cst_23 = arith.constant dense<0.000000e+00> : vector<32x128xf32>
    %18 = tpu.matmul %1, %15, %cst_23 {dimension_numbers = #tpu.dot_dimension_numbers<[1], [0], [0], [1], [0, 0, 1, 1], [], []>} : vector<32x32xf32>, vector<32x128xf32>, vector<32x128xf32> -> vector<32x128xf32>
    %19 = arith.addf %17, %18 : vector<32x128xf32>
    %cst_24 = arith.constant dense<0.000000e+00> : vector<128xf32>
    %20 = vector.multi_reduction <add>, %19, %cst_24 [0] : vector<32x128xf32> to vector<128xf32>
    %21 = vector.shape_cast %20 : vector<128xf32> to vector<1x128xf32>
    %22 = arith.mulf %19, %19 : vector<32x128xf32>
    %cst_25 = arith.constant dense<0.000000e+00> : vector<128xf32>
    %23 = vector.multi_reduction <add>, %22, %cst_25 [0] : vector<32x128xf32> to vector<128xf32>
    %24 = vector.shape_cast %23 : vector<128xf32> to vector<1x128xf32>
    %cst_26 = arith.constant dense<0.000000e+00> : vector<1x8xf32>
    %25 = tpu.matmul %21, %2, %cst_26 {dimension_numbers = #tpu.dot_dimension_numbers<[1], [0], [0], [1], [0, 0, 1, 1], [], []>} : vector<1x128xf32>, vector<128x8xf32>, vector<1x8xf32> -> vector<1x8xf32>
    %cst_27 = arith.constant dense<0.000000e+00> : vector<1x8xf32>
    %26 = tpu.matmul %24, %2, %cst_27 {dimension_numbers = #tpu.dot_dimension_numbers<[1], [0], [0], [1], [0, 0, 1, 1], [], []>} : vector<1x128xf32>, vector<128x8xf32>, vector<1x8xf32> -> vector<1x8xf32>
    %cst_28 = arith.constant 0.001953125 : f32
    %27 = vector.broadcast %cst_28 : f32 to vector<1x8xf32>
    %28 = arith.mulf %25, %27 : vector<1x8xf32>
    %cst_29 = arith.constant 0.001953125 : f32
    %29 = vector.broadcast %cst_29 : f32 to vector<1x8xf32>
    %30 = arith.mulf %26, %29 : vector<1x8xf32>
    %31 = arith.mulf %28, %28 : vector<1x8xf32>
    %32 = arith.subf %30, %31 : vector<1x8xf32>
    %cst_30 = arith.constant 9.99999974E-6 : f32
    %33 = vector.broadcast %cst_30 : f32 to vector<1x8xf32>
    %34 = arith.addf %32, %33 : vector<1x8xf32>
    %35 = math.rsqrt %34 : vector<1x8xf32>
    %36 = arith.mulf %5, %35 : vector<1x8xf32>
    %37 = arith.mulf %28, %36 : vector<1x8xf32>
    %38 = arith.subf %6, %37 : vector<1x8xf32>
    %cst_31 = arith.constant dense<0.000000e+00> : vector<1x128xf32>
    %39 = tpu.matmul %36, %3, %cst_31 {dimension_numbers = #tpu.dot_dimension_numbers<[1], [0], [0], [1], [0, 0, 1, 1], [], []>} : vector<1x8xf32>, vector<8x128xf32>, vector<1x128xf32> -> vector<1x128xf32>
    %cst_32 = arith.constant dense<0.000000e+00> : vector<1x128xf32>
    %40 = tpu.matmul %38, %3, %cst_32 {dimension_numbers = #tpu.dot_dimension_numbers<[1], [0], [0], [1], [0, 0, 1, 1], [], []>} : vector<1x8xf32>, vector<8x128xf32>, vector<1x128xf32> -> vector<1x128xf32>
    %41 = vector.broadcast %39 : vector<1x128xf32> to vector<32x128xf32>
    %42 = arith.mulf %19, %41 : vector<32x128xf32>
    %43 = vector.broadcast %40 : vector<1x128xf32> to vector<32x128xf32>
    %44 = arith.addf %42, %43 : vector<32x128xf32>
    %cst_33 = arith.constant 0.000000e+00 : f32
    %45 = vector.broadcast %cst_33 : f32 to vector<32x128xf32>
    %46 = arith.maximumf %44, %45 : vector<32x128xf32>
    %c0_34 = arith.constant 0 : index
    %c0_35 = arith.constant 0 : index
    %47 = vector.load %arg10[%c0_34, %c0_35] : memref<1x8xf32, #tpu.memory_space<vmem>>, vector<1x8xf32>
    %c0_36 = arith.constant 0 : index
    %c0_37 = arith.constant 0 : index
    %48 = vector.load %arg11[%c0_36, %c0_37] : memref<1x8xf32, #tpu.memory_space<vmem>>, vector<1x8xf32>
    %c0_38 = arith.constant 0 : index
    %c0_39 = arith.constant 0 : index
    %c0_40 = arith.constant 0 : index
    %49 = vector.load %arg3[%c0_38, %c0_39, %c0_40] : memref<3x128x128xf32, #tpu.memory_space<vmem>>, vector<1x128x128xf32>
    %50 = vector.shape_cast %49 : vector<1x128x128xf32> to vector<128x128xf32>
    %cst_41 = arith.constant dense<0.000000e+00> : vector<32x128xf32>
    %51 = tpu.matmul %46, %50, %cst_41 {dimension_numbers = #tpu.dot_dimension_numbers<[1], [0], [0], [1], [0, 0, 1, 1], [], []>} : vector<32x128xf32>, vector<128x128xf32>, vector<32x128xf32> -> vector<32x128xf32>
    %c1_42 = arith.constant 1 : index
    %c0_43 = arith.constant 0 : index
    %c0_44 = arith.constant 0 : index
    %52 = vector.load %arg3[%c1_42, %c0_43, %c0_44] : memref<3x128x128xf32, #tpu.memory_space<vmem>>, vector<1x128x128xf32>
    %53 = vector.shape_cast %52 : vector<1x128x128xf32> to vector<128x128xf32>
    %cst_45 = arith.constant dense<0.000000e+00> : vector<32x128xf32>
    %54 = tpu.matmul %46, %53, %cst_45 {dimension_numbers = #tpu.dot_dimension_numbers<[1], [0], [0], [1], [0, 0, 1, 1], [], []>} : vector<32x128xf32>, vector<128x128xf32>, vector<32x128xf32> -> vector<32x128xf32>
    %c2_46 = arith.constant 2 : index
    %c0_47 = arith.constant 0 : index
    %c0_48 = arith.constant 0 : index
    %55 = vector.load %arg3[%c2_46, %c0_47, %c0_48] : memref<3x128x128xf32, #tpu.memory_space<vmem>>, vector<1x128x128xf32>
    %56 = vector.shape_cast %55 : vector<1x128x128xf32> to vector<128x128xf32>
    %cst_49 = arith.constant dense<0.000000e+00> : vector<32x128xf32>
    %57 = tpu.matmul %46, %56, %cst_49 {dimension_numbers = #tpu.dot_dimension_numbers<[1], [0], [0], [1], [0, 0, 1, 1], [], []>} : vector<32x128xf32>, vector<128x128xf32>, vector<32x128xf32> -> vector<32x128xf32>
    %cst_50 = arith.constant dense<0.000000e+00> : vector<32x128xf32>
    %58 = tpu.matmul %0, %51, %cst_50 {dimension_numbers = #tpu.dot_dimension_numbers<[1], [0], [0], [1], [0, 0, 1, 1], [], []>} : vector<32x32xf32>, vector<32x128xf32>, vector<32x128xf32> -> vector<32x128xf32>
    %59 = arith.addf %54, %58 : vector<32x128xf32>
    %cst_51 = arith.constant dense<0.000000e+00> : vector<32x128xf32>
    %60 = tpu.matmul %1, %57, %cst_51 {dimension_numbers = #tpu.dot_dimension_numbers<[1], [0], [0], [1], [0, 0, 1, 1], [], []>} : vector<32x32xf32>, vector<32x128xf32>, vector<32x128xf32> -> vector<32x128xf32>
    %61 = arith.addf %59, %60 : vector<32x128xf32>
    %cst_52 = arith.constant dense<0.000000e+00> : vector<128xf32>
    %62 = vector.multi_reduction <add>, %61, %cst_52 [0] : vector<32x128xf32> to vector<128xf32>
    %63 = vector.shape_cast %62 : vector<128xf32> to vector<1x128xf32>
    %64 = arith.mulf %61, %61 : vector<32x128xf32>
    %cst_53 = arith.constant dense<0.000000e+00> : vector<128xf32>
    %65 = vector.multi_reduction <add>, %64, %cst_53 [0] : vector<32x128xf32> to vector<128xf32>
    %66 = vector.shape_cast %65 : vector<128xf32> to vector<1x128xf32>
    %cst_54 = arith.constant dense<0.000000e+00> : vector<1x8xf32>
    %67 = tpu.matmul %63, %2, %cst_54 {dimension_numbers = #tpu.dot_dimension_numbers<[1], [0], [0], [1], [0, 0, 1, 1], [], []>} : vector<1x128xf32>, vector<128x8xf32>, vector<1x8xf32> -> vector<1x8xf32>
    %cst_55 = arith.constant dense<0.000000e+00> : vector<1x8xf32>
    %68 = tpu.matmul %66, %2, %cst_55 {dimension_numbers = #tpu.dot_dimension_numbers<[1], [0], [0], [1], [0, 0, 1, 1], [], []>} : vector<1x128xf32>, vector<128x8xf32>, vector<1x8xf32> -> vector<1x8xf32>
    %cst_56 = arith.constant 0.001953125 : f32
    %69 = vector.broadcast %cst_56 : f32 to vector<1x8xf32>
    %70 = arith.mulf %67, %69 : vector<1x8xf32>
    %cst_57 = arith.constant 0.001953125 : f32
    %71 = vector.broadcast %cst_57 : f32 to vector<1x8xf32>
    %72 = arith.mulf %68, %71 : vector<1x8xf32>
    %73 = arith.mulf %70, %70 : vector<1x8xf32>
    %74 = arith.subf %72, %73 : vector<1x8xf32>
    %cst_58 = arith.constant 9.99999974E-6 : f32
    %75 = vector.broadcast %cst_58 : f32 to vector<1x8xf32>
    %76 = arith.addf %74, %75 : vector<1x8xf32>
    %77 = math.rsqrt %76 : vector<1x8xf32>
    %78 = arith.mulf %47, %77 : vector<1x8xf32>
    %79 = arith.mulf %70, %78 : vector<1x8xf32>
    %80 = arith.subf %48, %79 : vector<1x8xf32>
    %cst_59 = arith.constant dense<0.000000e+00> : vector<1x128xf32>
    %81 = tpu.matmul %78, %3, %cst_59 {dimension_numbers = #tpu.dot_dimension_numbers<[1], [0], [0], [1], [0, 0, 1, 1], [], []>} : vector<1x8xf32>, vector<8x128xf32>, vector<1x128xf32> -> vector<1x128xf32>
    %cst_60 = arith.constant dense<0.000000e+00> : vector<1x128xf32>
    %82 = tpu.matmul %80, %3, %cst_60 {dimension_numbers = #tpu.dot_dimension_numbers<[1], [0], [0], [1], [0, 0, 1, 1], [], []>} : vector<1x8xf32>, vector<8x128xf32>, vector<1x128xf32> -> vector<1x128xf32>
    %83 = vector.broadcast %81 : vector<1x128xf32> to vector<32x128xf32>
    %84 = arith.mulf %61, %83 : vector<32x128xf32>
    %85 = vector.broadcast %82 : vector<1x128xf32> to vector<32x128xf32>
    %86 = arith.addf %84, %85 : vector<32x128xf32>
    %cst_61 = arith.constant 0.000000e+00 : f32
    %87 = vector.broadcast %cst_61 : f32 to vector<32x128xf32>
    %88 = arith.maximumf %86, %87 : vector<32x128xf32>
    %c0_62 = arith.constant 0 : index
    %c0_63 = arith.constant 0 : index
    %89 = vector.load %arg12[%c0_62, %c0_63] : memref<32x128xf32, #tpu.memory_space<vmem>>, vector<32x128xf32>
    tpu.vector_store %arg12[%c0_62, %c0_63], %88 {strides = array<i32>} : memref<32x128xf32, #tpu.memory_space<vmem>>, vector<32x128xf32>,
    return
  }
  func.func @transform_0(%arg0: i32) -> (i32, i32) {
    %c0_i32 = arith.constant 0 : i32
    %c0_i32_0 = arith.constant 0 : i32
    %c0_i32_1 = arith.constant 0 : i32
    return %c0_i32, %c0_i32_0 : i32, i32
  }
  func.func @transform_1(%arg0: i32) -> (i32, i32, i32) {
    %c0_i32 = arith.constant 0 : i32
    %c0_i32_0 = arith.constant 0 : i32
    %c0_i32_1 = arith.constant 0 : i32
    %c0_i32_2 = arith.constant 0 : i32
    return %c0_i32, %c0_i32_0, %c0_i32_1 : i32, i32, i32
  }
  func.func @transform_2(%arg0: i32) -> (i32, i32, i32) {
    %c0_i32 = arith.constant 0 : i32
    %c0_i32_0 = arith.constant 0 : i32
    %c0_i32_1 = arith.constant 0 : i32
    %c0_i32_2 = arith.constant 0 : i32
    return %c0_i32, %c0_i32_0, %c0_i32_1 : i32, i32, i32
  }
  func.func @transform_3(%arg0: i32) -> (i32, i32) {
    %c0_i32 = arith.constant 0 : i32
    %c0_i32_0 = arith.constant 0 : i32
    %c0_i32_1 = arith.constant 0 : i32
    return %c0_i32, %c0_i32_0 : i32, i32
  }
  func.func @transform_4(%arg0: i32) -> (i32, i32) {
    %c0_i32 = arith.constant 0 : i32
    %c0_i32_0 = arith.constant 0 : i32
    %c0_i32_1 = arith.constant 0 : i32
    return %c0_i32, %c0_i32_0 : i32, i32
  }
  func.func @transform_5(%arg0: i32) -> (i32, i32) {
    %c0_i32 = arith.constant 0 : i32
    %c0_i32_0 = arith.constant 0 : i32
    %c0_i32_1 = arith.constant 0 : i32
    return %c0_i32, %c0_i32_0 : i32, i32
  }
  func.func @transform_6(%arg0: i32) -> (i32, i32) {
    %c0_i32 = arith.constant 0 : i32
    %c0_i32_0 = arith.constant 0 : i32
    %c0_i32_1 = arith.constant 0 : i32
    return %c0_i32, %c0_i32_0 : i32, i32
  }
  func.func @transform_7(%arg0: i32) -> (i32, i32) {
    %c0_i32 = arith.constant 0 : i32
    %c0_i32_0 = arith.constant 0 : i32
    %c0_i32_1 = arith.constant 0 : i32
    return %c0_i32, %c0_i32_0 : i32, i32
  }
  func.func @transform_8(%arg0: i32) -> (i32, i32) {
    %c0_i32 = arith.constant 0 : i32
    %c0_i32_0 = arith.constant 0 : i32
    %c0_i32_1 = arith.constant 0 : i32
    return %c0_i32, %c0_i32_0 : i32, i32
  }
  func.func @transform_9(%arg0: i32) -> (i32, i32) {
    %c0_i32 = arith.constant 0 : i32
    %c0_i32_0 = arith.constant 0 : i32
    %c0_i32_1 = arith.constant 0 : i32
    return %c0_i32, %c0_i32_0 : i32, i32
  }
  func.func @transform_10(%arg0: i32) -> (i32, i32) {
    %c0_i32 = arith.constant 0 : i32
    %c0_i32_0 = arith.constant 0 : i32
    %c0_i32_1 = arith.constant 0 : i32
    return %c0_i32, %c0_i32_0 : i32, i32
  }
  func.func @transform_11(%arg0: i32) -> (i32, i32) {
    %c0_i32 = arith.constant 0 : i32
    %c0_i32_0 = arith.constant 0 : i32
    %c0_i32_1 = arith.constant 0 : i32
    return %c0_i32, %c0_i32_0 : i32, i32
  }
}

</mosaic_0001>

<bundles_post_ra>
// kernel: tpu_custom_call.1
= control target key start
LH: loop header
LB: loop body
LE: loop exit
PB: predicated region body
PF: predicated region fallthrough
CT: control target
= control target key end

     0   :  { %16 = vsyncpa [#allocation3], 0  ;;  %s3205_s0 = inlined_call_operand.vmem [shape: f32[32,64], index: 0, kind: input, shape index: {}]   ;;  %s3206_s1 = inlined_call_operand.hbm [shape: f32[3,64,128], index: 1, kind: input, shape index: {}]   ;;  %s3207_s2 = inlined_call_operand.hbm [shape: f32[3,128,128], index: 2, kind: input, shape index: {}]   ;;  %s3208_s3 = inlined_call_operand.vmem [shape: f32[32,32], index: 3, kind: input, shape index: {}]   ;;  %s3209_s4 = inlined_call_operand.vmem [shape: f32[32,32], index: 4, kind: input, shape index: {}]   ;;  %s3210_s5 = inlined_call_operand.vmem [shape: f32[128,8], index: 5, kind: input, shape index: {}]   ;;  %s3211_s6 = inlined_call_operand.vmem [shape: f32[8,128], index: 6, kind: input, shape index: {}]   ;;  %s3212_s7 = inlined_call_operand.vmem [shape: f32[1,8], index: 7, kind: input, shape index: {}]   ;;  %s3213_s8 = inlined_call_operand.vmem [shape: f32[1,8], index: 8, kind: input, shape index: {}]   ;;  %s3214_s9 = inlined_call_operand.vmem [shape: f32[1,8], index: 9, kind: input, shape index: {}]   ;;  %s3215_s10 = inlined_call_operand.vmem [shape: f32[1,8], index: 10, kind: input, shape index: {}]   ;;  %s3216_s11 = inlined_call_operand.hbm [shape: f32[32,128], index: 11, kind: output, shape index: {}]  }
   0x1   :  { %17 = vsyncpa [#allocation6], 0 }
   0x2   :  { %18 = vsyncpa [#allocation4], 0  ;;  %s2773_s17 = smov [#allocation2]   ;;  %s2701_s21 = scalar_lea.hbm %s3206_s1, 3072 }
   0x3   :  { %s26_s18 = sshll.u32 %s2773_s17, 4  ;;  %p2702_p0 = scmp.ne.s32.totalorder %s3206_s1, %s2701_s21  ;;  %s27_s18 = int_to_ptr.vmem [resolvable:$true] %s26_s18 }
   0x4   :  { %p2705_p1 = scmp.lt.u32.totalorder %s2701_s21, %s3206_s1 }
   0x6   :  { %p2707_p2 = pnand %p2705_p1, %p2702_p0 }
   0x8   :  { %2710 = shalt.err (!%p2707_p2)
}
   0x9   :  { %s2711_s26 = scalar_lea.vmem %s27_s18, 3072  ;;  %p2716_p4 = scmp.lt.s32.totalorder %s27_s18, %s27_s18 }
   0xa   :  { %p2712_p3 = scmp.ne.s32.totalorder %s27_s18, %s2711_s26  ;;  %p2717_p5 = scmp.lt.s32.totalorder %s2711_s26, %s2711_s26 }
   0xc   :  { %p2718_p6 = por %p2717_p5, %p2716_p4 }
   0xe   :  { %p2719_p7 = pnand %p2718_p6, %p2712_p3 }
  0x10   :  { %2722 = shalt.err (!%p2719_p7)
}
  0x11   :  { %s2774_s27 = smov 128   ;;  %s2775_s28 = smov 8  }
  0x12   :  { %32 = dma.hbm_to_vmem [thread:$0]  %s3206_s1, 3072, %s27_s18, [#allocation3], %s2774_s27, %s2774_s27, %s2775_s28  }
  0x13   :  { %s2776_s12 = smov [#allocation5]   ;;  %s2723_s16 = scalar_lea.hbm %s3207_s2, 6144 }
  0x14   :  { %s38_s13 = sshll.u32 %s2776_s12, 4  ;;  %p2724_p8 = scmp.ne.s32.totalorder %s3207_s2, %s2723_s16  ;;  %s39_s13 = int_to_ptr.vmem [resolvable:$true] %s38_s13 }
  0x15   :  { %p2727_p9 = scmp.lt.u32.totalorder %s2723_s16, %s3207_s2 }
  0x17   :  { %p2729_p10 = pnand %p2727_p9, %p2724_p8 }
  0x19   :  { %2732 = shalt.err (!%p2729_p10)
}
  0x1a   :  { %s2733_s22 = scalar_lea.vmem %s39_s13, 6144  ;;  %p2738_p12 = scmp.lt.s32.totalorder %s39_s13, %s39_s13 }
  0x1b   :  { %p2734_p11 = scmp.ne.s32.totalorder %s39_s13, %s2733_s22  ;;  %p2739_p13 = scmp.lt.s32.totalorder %s2733_s22, %s2733_s22 }
  0x1d   :  { %p2740_p0 = por %p2739_p13, %p2738_p12 }
  0x1f   :  { %p2741_p1 = pnand %p2740_p0, %p2734_p11 }
  0x21   :  { %2744 = shalt.err (!%p2741_p1)
}
  0x22   :  { %44 = dma.hbm_to_vmem [thread:$0]  %s3207_s2, 6144, %s39_s13, [#allocation6], %s2774_s27, %s2774_s27, %s2775_s28  }
  0x23   :  { %2767 = dma.done.wait [#allocation3], 3072  }
  0x24   :  { %2768 = vsyncadd [#allocation3], 4294964224 }
  0x25   :  { %2769 = dma.done.wait [#allocation6], 6144  }
  0x26   :  { %2770 = vsyncadd [#allocation6], 4294961152  ;;  %v98_v0 = vld [vmem:[#allocation2] sm:$0xff]  ;;  %v99_v1 = vld [vmem:[#allocation2 + $0x8] sm:$0xff]  ;;  %vm106_vm0 = vcmask 523264   ;;  %vm307_vm1 = vcmask 261120  }
  0x27   :  { %v100_v2 = vld [vmem:[#allocation2 + $0x10] sm:$0xff]  ;;  %v2401_v3 = vpack.c.bf16 %v99_v1, %v98_v0  ;;  %v101_v4 = vld [vmem:[#allocation2 + $0x18] sm:$0xff]  ;;  %v102_v6 = vld [vmem:[#allocation2 + $0x20] sm:$0xff]  ;;  %v2777_v32 = vmov 0.0|0.0   ;;  %vm2778_vm2 = vmmov 0   ;;  %vm762_vm3 = vcmask 64512  }
  0x28   :  { %v2405_v5 = vpack.c.bf16 %v101_v4, %v100_v2  ;;  %v103_v7 = vld [vmem:[#allocation2 + $0x28] sm:$0xff]  ;;  %v2874_v8 = vld [vmem:[%s3205_s0] sm:$0xff]  ;;  %v216_v11 = vld [vmem:[#allocation2 + $0x90] sm:$0xff] }
  0x29   :  { %2402 = vmatprep.subr.bf16.mxu0 %v2401_v3  ;;  %2021 = vmatprep.mubr.msk.f32.mxu0 %vm106_vm0, %v2874_v8  ;;  %v214_v9 = vld [vmem:[#allocation2 + $0x80] sm:$0xff]  ;;  %v215_v10 = vld [vmem:[#allocation2 + $0x88] sm:$0xff]  ;;  %v2409_v12 = vpack.c.bf16 %v103_v7, %v102_v6  ;;  %v104_v13 = vld [vmem:[#allocation2 + $0x30] sm:$0xff] }
  0x2a   :  { %2404 = vmatpush3.bf16.msra.mxu0 %v2401_v3  ;;  %2043 = vmatprep.mubr.msk.f32.mxu1 %vm106_vm0, %v2874_v8  ;;  %v2417_v14 = vpack.c.bf16 %v215_v10, %v214_v9  ;;  %v217_v15 = vld [vmem:[#allocation2 + $0x98] sm:$0xff]  ;;  %v218_v18 = vld [vmem:[#allocation2 + $0xa0] sm:$0xff]  ;;  %v219_v19 = vld [vmem:[#allocation2 + $0xa8] sm:$0xff] }
  0x2b   :  { %2406 = vmatprep.subr.bf16.mxu0 %v2405_v5  ;;  %v105_v16 = vld [vmem:[#allocation2 + $0x38] sm:$0xff]  ;;  %v2421_v17 = vpack.c.bf16 %v217_v15, %v216_v11  ;;  %v2425_v21 = vpack.c.bf16 %v219_v19, %v218_v18  ;;  %v220_v22 = vld [vmem:[#allocation2 + $0xb0] sm:$0xff]  ;;  %v2883_v25 = vld [vmem:[%s3205_s0 + $0x8] sm:$0xff] }
  0x2c   :  { %2418 = vmatprep.subr.bf16.mxu1 %v2417_v14  ;;  %v2413_v20 = vpack.c.bf16 %v105_v16, %v104_v13  ;;  %v221_v23 = vld [vmem:[#allocation2 + $0xb8] sm:$0xff]  ;;  %v2888_v26 = vld [vmem:[%s3205_s0 + $0x10] sm:$0xff]  ;;  %v2910_v28 = vld [vmem:[%s3208_s3] sm:$0xff] }
  0x2d   :  { %2420 = vmatpush3.bf16.msra.mxu1 %v2417_v14  ;;  %v2429_v24 = vpack.c.bf16 %v221_v23, %v220_v22  ;;  %v2897_v27 = vld [vmem:[%s3205_s0 + $0x18] sm:$0xff]  ;;  %v75_v29 = vld [vmem:[%s3210_s5] sm:$0xff]  ;;  %v76_v30 = vld [vmem:[%s3210_s5 + $0x8] sm:$0xff] }
  0x2e   :  { %2408 = vmatpush3.bf16.msra.mxu0 %v2405_v5  ;;  %2422 = vmatprep.subr.bf16.mxu1 %v2421_v17  ;;  %v77_v31 = vld [vmem:[%s3210_s5 + $0x10] sm:$0xff]  ;;  %v2924_v33 = vpack.c.bf16 %v76_v30, %v75_v29  ;;  %v78_v34 = vld [vmem:[%s3210_s5 + $0x18] sm:$0xff]  ;;  %v79_v36 = vld [vmem:[%s3210_s5 + $0x20] sm:$0xff] }
  0x2f   :  { %2410 = vmatprep.subr.bf16.mxu0 %v2409_v12  ;;  %v2930_v35 = vpack.c.bf16 %v78_v34, %v77_v31  ;;  %v80_v37 = vld [vmem:[%s3210_s5 + $0x28] sm:$0xff]  ;;  %v205_v42 = vld [vmem:[#allocation2 + $0x40] sm:$0xff]  ;;  %v207_v51 = vld [vmem:[#allocation2 + $0x50] sm:$0xff] }
  0x30   :  { %v2940_v38 = vpack.c.bf16 %v80_v37, %v79_v36  ;;  %v206_v43 = vld [vmem:[#allocation2 + $0x48] sm:$0xff]  ;;  %v208_v52 = vld [vmem:[#allocation2 + $0x58] sm:$0xff]  ;;  %v2953_v57 = vld [vmem:[%s3208_s3 + $0x10] sm:$0xff] }
  0x31   :  { %2424 = vmatpush3.bf16.msra.mxu1 %v2421_v17  ;;  %v2441_v49 = vpack.c.bf16 %v206_v43, %v205_v42  ;;  %v2948_v54 = vld [vmem:[%s3208_s3 + $0x8] sm:$0xff]  ;;  %v2445_v56 = vpack.c.bf16 %v208_v52, %v207_v51  ;;  %v209_v59 = vld [vmem:[#allocation2 + $0x60] sm:$0xff]  ;;  %v2962_v61 = vld [vmem:[%s3208_s3 + $0x18] sm:$0xff] }
  0x32   :  { %2412 = vmatpush3.bf16.msra.mxu0 %v2409_v12  ;;  %2426 = vmatprep.subr.bf16.mxu1 %v2425_v21  ;;  %v210_v60 = vld [vmem:[#allocation2 + $0x68] sm:$0xff]  ;;  %v211_v63 = vld [vmem:[#allocation2 + $0x70] sm:$0xff]  ;;  %v212_v0 = vld [vmem:[#allocation2 + $0x78] sm:$0xff] }
  0x33   :  { %2414 = vmatprep.subr.bf16.mxu0 %v2413_v20  ;;  %v2449_v62 = vpack.c.bf16 %v210_v60, %v209_v59  ;;  %v2453_v1 = vpack.c.bf16 %v212_v0, %v211_v63  ;;  %v2975_v2 = vld [vmem:[%s3209_s4] sm:$0xff]  ;;  %v2984_v3 = vld [vmem:[%s3209_s4 + $0x8] sm:$0xff]  ;;  %v2989_v4 = vld [vmem:[%s3209_s4 + $0x10] sm:$0xff] }
  0x34   :  { %v2999_v5 = vld [vmem:[%s3209_s4 + $0x18] sm:$0xff]  ;;  %v81_v6 = vld [vmem:[%s3210_s5 + $0x30] sm:$0xff]  ;;  %v83_v9 = vld [vmem:[%s3210_s5 + $0x40] sm:$0xff] }
  0x35   :  { %2428 = vmatpush3.bf16.msra.mxu1 %v2425_v21  ;;  %v82_v7 = vld [vmem:[%s3210_s5 + $0x38] sm:$0xff]  ;;  %v84_v10 = vld [vmem:[%s3210_s5 + $0x48] sm:$0xff]  ;;  %v85_v12 = vld [vmem:[%s3210_s5 + $0x50] sm:$0xff]  ;;  %v2779_v21 = vmov 0.0  }
  0x36   :  { %2416 = vmatpush3.bf16.msra.mxu0 %v2413_v20  ;;  %2430 = vmatprep.subr.bf16.mxu1 %v2429_v24  ;;  %v3027_v11 = vpack.c.bf16 %v84_v10, %v83_v9  ;;  %v86_v13 = vld [vmem:[%s3210_s5 + $0x58] sm:$0xff]  ;;  %v87_v15 = vld [vmem:[%s3210_s5 + $0x60] sm:$0xff]  ;;  %v88_v16 = vld [vmem:[%s3210_s5 + $0x68] sm:$0xff] }
  0x37   :  { %v3039_v14 = vpack.c.bf16 %v86_v13, %v85_v12  ;;  %v3051_v17 = vpack.c.bf16 %v88_v16, %v87_v15  ;;  %v89_v18 = vld [vmem:[%s3210_s5 + $0x70] sm:$0xff]  ;;  %v90_v19 = vld [vmem:[%s3210_s5 + $0x78] sm:$0xff]  ;;  %v1054_v63 = vld [vmem:[#allocation5 + $0x120] sm:$0xff] }
  0x38   :  { %v3063_v20 = vpack.c.bf16 %v90_v19, %v89_v18  ;;  %v1052_v59 = vld [vmem:[#allocation5 + $0x110] sm:$0xff]  ;;  %v1053_v60 = vld [vmem:[#allocation5 + $0x118] sm:$0xff]  ;;  %v1055_v0 = vld [vmem:[#allocation5 + $0x128] sm:$0xff] }
  0x39   :  { %2022 = vmatmul.mubr.msk.f32.vlgmr.msra.gmra.mrb[0].mxu0 %vm106_vm0, %v2883_v25  ;;  %2432 = vmatpush3.bf16.msra.mxu1 %v2429_v24  ;;  %v1058_v10 = vld [vmem:[#allocation5 + $0x140] sm:$0xff]  ;;  %v1059_v12 = vld [vmem:[#allocation5 + $0x148] sm:$0xff] }
  0x3a   :  { %2024 = vmatprep.mubr.msk.f32.mxu0 %vm106_vm0, %v2888_v26  ;;  %2465 = vmatprep.subr.bf16.mxu1 %v2777_v32  ;;  %v2561_v13 = vpack.c.bf16 %v1059_v12, %v1058_v10  ;;  %v1062_v12 = vld [vmem:[#allocation5 + $0x160] sm:$0xff] }
  0x3c   :  { %2044 = vmatmul.mubr.msk.f32.vlgmr.msra.gmra.mrb[0].mxu1 %vm106_vm0, %v2883_v25 }
  0x3d   :  { %2025 = vmatmul.mubr.msk.f32.gmra.mrb[2].mxu0 %vm106_vm0, %v2897_v27  ;;  %2046 = vmatprep.mubr.msk.f32.mxu1 %vm106_vm0, %v2888_v26 }
  0x3e   :  { %2057 = vmatprep.mubr.msk.f32.mxu0 %vm307_vm1, %v2910_v28  ;;  %2467 = vmatpush3.bf16.msra.mxu1 %v2924_v33 }
  0x3f   :  { %2468 = vmatprep.subr.bf16.mxu1 %v2777_v32 }
  0x40   :  { %2047 = vmatmul.mubr.msk.f32.gmra.mrb[2].mxu1 %vm106_vm0, %v2897_v27 }
  0x41   :  { %2131 = vmatprep.mubr.msk.f32.mxu1 %vm2778_vm2, %v2779_v21 }
  0x42   :  { %2470 = vmatpush3.bf16.msra.mxu1 %v2930_v35 }
  0x43   :  { %2471 = vmatprep.subr.bf16.mxu1 %v2777_v32 }
  0x46   :  { %2473 = vmatpush3.bf16.msra.mxu1 %v2940_v38 }
  0x47   :  { %2474 = vmatprep.subr.bf16.mxu1 %v2777_v32 }
 0x10c   :  { %v2023_v39 = vpop.f32.mrb[0].mxu0 }
 0x10d   :  { %v185_v40 = vpop.f32.mrb[1].mxu0 }
 0x10e   :  { %v2433_v41 = vpack.c.bf16 %v2023_v39, %v185_v40 }
 0x10f   :  { %v2045_v45 = vpop.f32.mrb[0].mxu1 }
 0x110   :  { %v2026_v44 = vpop.f32.mrb[2].mxu0  ;;  %2434 = vmatprep.subr.bf16.mxu0 %v2433_v41  ;;  %v288_v47 = vpop.f32.mrb[1].mxu1 }
 0x111   :  { %v195_v46 = vpop.f32.mrb[3].mxu0  ;;  %2436 = vmatpush3.bf16.msra.mxu0 %v2433_v41  ;;  %v2457_v50 = vpack.c.bf16 %v2045_v45, %v288_v47 }
 0x112   :  { %v2437_v48 = vpack.c.bf16 %v2026_v44, %v195_v46 }
 0x113   :  { %v2048_v53 = vpop.f32.mrb[2].mxu1 }
 0x114   :  { %2438 = vmatprep.subr.bf16.mxu0 %v2437_v48  ;;  %v298_v55 = vpop.f32.mrb[3].mxu1 }
 0x115   :  { %2440 = vmatpush3.bf16.msra.mxu0 %v2437_v48  ;;  %v2461_v58 = vpack.c.bf16 %v2048_v53, %v298_v55  ;;  %v3097_v53 = vld [vmem:[%s3211_s6] sm:$0xff] }
 0x116   :  { %2442 = vmatprep.subr.bf16.mxu0 %v2441_v49  ;;  %v1050_v55 = vld [vmem:[#allocation5 + $0x100] sm:$0xff] }
 0x118   :  { %2058 = vmatmul.mubr.msk.f32.vlgmr.msra.gmra.mrb[4].mxu0 %vm307_vm1, %v2948_v54 }
 0x119   :  { %2444 = vmatpush3.bf16.msra.mxu0 %v2441_v49  ;;  %2060 = vmatprep.mubr.msk.f32.mxu0 %vm307_vm1, %v2953_v57 }
 0x11a   :  { %2446 = vmatprep.subr.bf16.mxu0 %v2445_v56 }
 0x11c   :  { %2061 = vmatmul.mubr.msk.f32.gmra.mrb[6].mxu0 %vm307_vm1, %v2962_v61 }
 0x11d   :  { %2448 = vmatpush3.bf16.msra.mxu0 %v2445_v56  ;;  %2079 = vmatprep.mubr.msk.f32.mxu0 %vm106_vm0, %v2874_v8  ;;  %v3015_v8 = vpack.c.bf16 %v82_v7, %v81_v6  ;;  %v1051_v56 = vld [vmem:[#allocation5 + $0x108] sm:$0xff]  ;;  %v1056_v6 = vld [vmem:[#allocation5 + $0x130] sm:$0xff]  ;;  %v1057_v7 = vld [vmem:[#allocation5 + $0x138] sm:$0xff] }
 0x11e   :  { %2450 = vmatprep.subr.bf16.mxu0 %v2449_v62  ;;  %v2557_v9 = vpack.c.bf16 %v1057_v7, %v1056_v6  ;;  %v943_v7 = vld [vmem:[#allocation5 + $0x60] sm:$0xff] }
 0x11f   :  { %2476 = vmatpush3.bf16.msra.mxu1 %v3015_v8 }
 0x120   :  { %2477 = vmatprep.subr.bf16.mxu1 %v2777_v32 }
 0x121   :  { %2452 = vmatpush3.bf16.msra.mxu0 %v2449_v62  ;;  %v2549_v62 = vpack.c.bf16 %v1053_v60, %v1052_v59  ;;  %v941_v60 = vld [vmem:[#allocation5 + $0x50] sm:$0xff] }
 0x122   :  { %2454 = vmatprep.subr.bf16.mxu0 %v2453_v1 }
 0x123   :  { %2479 = vmatpush3.bf16.msra.mxu1 %v3027_v11 }
 0x124   :  { %2480 = vmatprep.subr.bf16.mxu1 %v2777_v32 }
 0x125   :  { %2456 = vmatpush3.bf16.msra.mxu0 %v2453_v1  ;;  %v2553_v1 = vpack.c.bf16 %v1055_v0, %v1054_v63  ;;  %v1060_v0 = vld [vmem:[#allocation5 + $0x150] sm:$0xff] }
 0x126   :  { %2458 = vmatprep.subr.bf16.mxu0 %v2457_v50 }
 0x127   :  { %2482 = vmatpush3.bf16.msra.mxu1 %v3039_v14 }
 0x128   :  { %2080 = vmatmul.mubr.msk.f32.vlgmr.msra.gmra.mrb[4].mxu0 %vm106_vm0, %v2883_v25  ;;  %2483 = vmatprep.subr.bf16.mxu1 %v2777_v32 }
 0x129   :  { %2460 = vmatpush3.bf16.msra.mxu0 %v2457_v50  ;;  %2082 = vmatprep.mubr.msk.f32.mxu0 %vm106_vm0, %v2888_v26 }
 0x12a   :  { %2462 = vmatprep.subr.bf16.mxu0 %v2461_v58 }
 0x12b   :  { %2485 = vmatpush3.bf16.msra.mxu1 %v3051_v17 }
 0x12c   :  { %2083 = vmatmul.mubr.msk.f32.gmra.mrb[6].mxu0 %vm106_vm0, %v2897_v27  ;;  %2486 = vmatprep.subr.bf16.mxu1 %v2777_v32 }
 0x12d   :  { %2464 = vmatpush3.bf16.msra.mxu0 %v2461_v58  ;;  %2093 = vmatprep.mubr.msk.f32.mxu0 %vm307_vm1, %v2975_v2  ;;  %v2545_v58 = vpack.c.bf16 %v1051_v56, %v1050_v55  ;;  %v939_v56 = vld [vmem:[#allocation5 + $0x40] sm:$0xff] }
 0x12e   :  { %2489 = vmatprep.subr.bf16.mxu0 %v2777_v32 }
 0x12f   :  { %2488 = vmatpush3.bf16.msra.mxu1 %v3063_v20 }
 0x130   :  { %2094 = vmatmul.mubr.msk.f32.vlgmr.msra.gmra.mrb[4].mxu0 %vm307_vm1, %v2984_v3  ;;  %2169 = vmatprep.subr.mxu1 %v2779_v21 }
 0x131   :  { %2096 = vmatprep.mubr.msk.f32.mxu0 %vm307_vm1, %v2989_v4  ;;  %2491 = vmatpush3.bf16.msra.mxu0 %v2924_v33 }
 0x132   :  { %2492 = vmatprep.subr.bf16.mxu0 %v2777_v32 }
 0x134   :  { %2097 = vmatmul.mubr.msk.f32.gmra.mrb[6].mxu0 %vm307_vm1, %v2999_v5 }
 0x135   :  { %2494 = vmatpush3.bf16.msra.mxu0 %v2930_v35  ;;  %2166 = vmatprep.mubr.msk.f32.mxu0 %vm2778_vm2, %v2779_v21 }
 0x136   :  { %2495 = vmatprep.subr.bf16.mxu0 %v2777_v32 }
 0x139   :  { %2497 = vmatpush3.bf16.msra.mxu0 %v2940_v38 }
 0x13a   :  { %2498 = vmatprep.subr.bf16.mxu0 %v2777_v32 }
 0x13d   :  { %2500 = vmatpush3.bf16.msra.mxu0 %v3015_v8 }
 0x13e   :  { %2501 = vmatprep.subr.bf16.mxu0 %v2777_v32 }
 0x141   :  { %2503 = vmatpush3.bf16.msra.mxu0 %v3027_v11 }
 0x142   :  { %2504 = vmatprep.subr.bf16.mxu0 %v2777_v32 }
 0x145   :  { %2506 = vmatpush3.bf16.msra.mxu0 %v3039_v14 }
 0x146   :  { %2507 = vmatprep.subr.bf16.mxu0 %v2777_v32 }
 0x149   :  { %2509 = vmatpush3.bf16.msra.mxu0 %v3051_v17 }
 0x14a   :  { %2510 = vmatprep.subr.bf16.mxu0 %v2777_v32 }
 0x14d   :  { %2512 = vmatpush3.bf16.msra.mxu0 %v3063_v20 }
 0x14e   :  { %2546 = vmatprep.subr.bf16.mxu0 %v2545_v58 }
 0x203   :  { %v3072_v22 = vpop.f32.mrb[4].mxu0 }
 0x204   :  { %v601_v23 = vmul.f32 %v3072_v22, %v3072_v22  ;;  %v3076_v24 = vpop.f32.mrb[5].mxu0 }
 0x205   :  { %v591_v25 = vadd.f32 %v3072_v22, %v3076_v24  ;;  %v600_v26 = vmul.f32 %v3076_v24, %v3076_v24 }
 0x207   :  { %v604_v27 = vadd.f32 %v601_v23, %v600_v26  ;;  %v3082_v29 = vpop.f32.mrb[6].mxu0 }
 0x208   :  { %v3084_v30 = vpop.f32.mrb[7].mxu0  ;;  %v603_v36 = vmul.f32 %v3082_v29, %v3082_v29 }
 0x209   :  { %v592_v31 = vadd.f32 %v591_v25, %v3084_v30  ;;  %v602_v34 = vmul.f32 %v3084_v30, %v3084_v30 }
 0x20b   :  { %v593_v37 = vadd.f32 %v3082_v29, %v592_v31  ;;  %v605_v39 = vadd.f32 %v604_v27, %v602_v34  ;;  %v96_v34 = vld [vmem:[%s3212_s7] sm:$0x1] }
 0x20d   :  { %v594_v40 = vrot.slane %v593_v37, 4  ;;  %v606_v41 = vadd.f32 %v605_v39, %v603_v36  ;;  %v931_v36 = vld [vmem:[#allocation5] sm:$0xff] }
 0x20f   :  { %v595_v42 = vadd.f32 %v594_v40, %v593_v37  ;;  %v607_v43 = vrot.slane %v606_v41, 4  ;;  %v932_v37 = vld [vmem:[#allocation5 + $0x8] sm:$0xff] }
 0x211   :  { %v596_v44 = vrot.slane %v595_v42, 2  ;;  %v608_v45 = vadd.f32 %v607_v43, %v606_v41  ;;  %v2513_v41 = vpack.c.bf16 %v932_v37, %v931_v36  ;;  %v933_v43 = vld [vmem:[#allocation5 + $0x10] sm:$0xff]  ;;  %v909_v36 = vlaneseq }
 0x213   :  { %v597_v46 = vadd.f32 %v596_v44, %v595_v42  ;;  %v609_v47 = vrot.slane %v608_v45, 2  ;;  %v97_v42 = vld [vmem:[%s3213_s8] sm:$0x1]  ;;  %v934_v44 = vld [vmem:[#allocation5 + $0x18] sm:$0xff]  ;;  %v910_v37 = vshrl.u32 %v909_v36, 7 }
 0x215   :  { %v598_v48 = vrot.slane %v597_v46, 1  ;;  %v610_v49 = vadd.f32 %v609_v47, %v608_v45  ;;  %v2517_v47 = vpack.c.bf16 %v934_v44, %v933_v43 }
 0x217   :  { %v599_v50 = vadd.f32 %v598_v48, %v597_v46  ;;  %v611_v51 = vrot.slane %v610_v49, 1  ;;  %v935_v48 = vld [vmem:[#allocation5 + $0x20] sm:$0xff] }
 0x219   :  { %2132 = vmatmul.mubr.f32.vlgmr.msra.gmra.mrb[4].mxu1 %v599_v50  ;;  %v612_v52 = vadd.f32 %v611_v51, %v610_v49  ;;  %v936_v49 = vld [vmem:[#allocation5 + $0x28] sm:$0xff]  ;;  %v937_v51 = vld [vmem:[#allocation5 + $0x30] sm:$0xff] }
 0x21a   :  { %2171 = vmatprep.mubr.msk.f32.mxu1 %vm2778_vm2, %v2779_v21  ;;  %2170 = vmatpush3.msra.mxu1 %v3097_v53  ;;  %v2521_v50 = vpack.c.bf16 %v936_v49, %v935_v48 }
 0x21b   :  { %2167 = vmatmul.mubr.f32.vlgmr.msra.gmra.mrb[8].mxu0 %v612_v52  ;;  %2174 = vmatprep.subr.mxu1 %v2779_v21  ;;  %v938_v52 = vld [vmem:[#allocation5 + $0x38] sm:$0xff] }
 0x21c   :  { %2548 = vmatpush3.bf16.msra.mxu0 %v2545_v58  ;;  %v2525_v55 = vpack.c.bf16 %v938_v52, %v937_v51  ;;  %v940_v58 = vld [vmem:[#allocation5 + $0x48] sm:$0xff] }
 0x21d   :  { %2550 = vmatprep.subr.bf16.mxu0 %v2549_v62  ;;  %v2529_v59 = vpack.c.bf16 %v940_v58, %v939_v56  ;;  %v1036_v56 = vld [vmem:[#allocation5 + $0x98] sm:$0xff] }
 0x220   :  { %2552 = vmatpush3.bf16.msra.mxu0 %v2549_v62  ;;  %v942_v62 = vld [vmem:[#allocation5 + $0x58] sm:$0xff] }
 0x221   :  { %2554 = vmatprep.subr.bf16.mxu0 %v2553_v1  ;;  %v2533_v63 = vpack.c.bf16 %v942_v62, %v941_v60 }
 0x224   :  { %2556 = vmatpush3.bf16.msra.mxu0 %v2553_v1  ;;  %v1061_v1 = vld [vmem:[#allocation5 + $0x158] sm:$0xff] }
 0x225   :  { %2558 = vmatprep.subr.bf16.mxu0 %v2557_v9  ;;  %v2565_v6 = vpack.c.bf16 %v1061_v1, %v1060_v0  ;;  %v1039_v0 = vld [vmem:[#allocation5 + $0xb0] sm:$0xff]  ;;  %v1040_v1 = vld [vmem:[#allocation5 + $0xb8] sm:$0xff] }
 0x228   :  { %2560 = vmatpush3.bf16.msra.mxu0 %v2557_v9  ;;  %v944_v9 = vld [vmem:[#allocation5 + $0x68] sm:$0xff] }
 0x229   :  { %2562 = vmatprep.subr.bf16.mxu0 %v2561_v13  ;;  %v2537_v10 = vpack.c.bf16 %v944_v9, %v943_v7  ;;  %v1041_v7 = vld [vmem:[#allocation5 + $0xc0] sm:$0xff]  ;;  %v1042_v9 = vld [vmem:[#allocation5 + $0xc8] sm:$0xff] }
 0x22c   :  { %2564 = vmatpush3.bf16.msra.mxu0 %v2561_v13  ;;  %v1063_v13 = vld [vmem:[#allocation5 + $0x168] sm:$0xff] }
 0x22d   :  { %2566 = vmatprep.subr.bf16.mxu0 %v2565_v6 }
 0x230   :  { %2568 = vmatpush3.bf16.msra.mxu0 %v2565_v6  ;;  %v2597_v6 = vpack.c.bf16 %v1040_v1, %v1039_v0 }
 0x2ec   :  { %v679_v15 = vpop.f32.mrb[4].mxu1 }
 0x2ed   :  { %v753_v16 = vmul.f32 0.001953125, %v679_v15  ;;  %v2133_v18 = vpop.f32.mrb[5].mxu1  ;;  %v2569_v15 = vpack.c.bf16 %v1063_v13, %v1062_v12  ;;  %v1043_v12 = vld [vmem:[#allocation5 + $0xd0] sm:$0xff]  ;;  %v1044_v13 = vld [vmem:[#allocation5 + $0xd8] sm:$0xff] }
 0x2ee   :  { %v749_v19 = vpop.f32.mrb[8].mxu0  ;;  %v946_v18 = vld [vmem:[#allocation5 + $0x78] sm:$0xff] }
 0x2ef   :  { %v755_v23 = vmul.f32 %v753_v16, %v753_v16  ;;  %v754_v25 = vmul.f32 0.001953125, %v749_v19  ;;  %v2168_v26 = vpop.f32.mrb[9].mxu0  ;;  %2570 = vmatprep.subr.bf16.mxu0 %v2569_v15 }
 0x2f0   :  { %2572 = vmatpush3.bf16.msra.mxu0 %v2569_v15  ;;  %v2605_v15 = vpack.c.bf16 %v1044_v13, %v1043_v12 }
 0x2f1   :  { %v756_v27 = vsub.f32 %v754_v25, %v755_v23  ;;  %v1064_v23 = vld [vmem:[#allocation5 + $0x170] sm:$0xff]  ;;  %v1065_v25 = vld [vmem:[#allocation5 + $0x178] sm:$0xff] }
 0x2f2   :  { %v2573_v26 = vpack.c.bf16 %v1065_v25, %v1064_v23  ;;  %v1047_v23 = vld [vmem:[#allocation5 + $0xf0] sm:$0xff]  ;;  %v1048_v25 = vld [vmem:[#allocation5 + $0xf8] sm:$0xff] }
 0x2f3   :  { %v757_v31 = vadd.f32 1e-05, %v756_v27  ;;  %v1033_v27 = vld [vmem:[#allocation5 + $0x80] sm:$0xff] }
 0x2f4   :  { %2574 = vmatprep.subr.bf16.mxu0 %v2573_v26 }
 0x2f5   :  { %2697 = vrsqrt.f32 %v757_v31  ;;  %v1034_v31 = vld [vmem:[#allocation5 + $0x88] sm:$0xff]  ;;  %2576 = vmatpush3.bf16.msra.mxu0 %v2573_v26 }
 0x2ff   :  { %v2698_v39 = vpop.eup %2697 }
 0x300   :  { %v759_v40 = vmul.f32 %v2698_v39, %v96_v34  ;;  %v2585_v34 = vpack.c.bf16 %v1034_v31, %v1033_v27  ;;  %v3112_v39 = vsub.s32 0, %v910_v37 }
 0x302   :  { %2172 = vmatmul.mubr.msk.f32.vlgmr.msra.gmra.mrb[6].mxu1 %vm762_vm3, %v759_v40  ;;  %v760_v45 = vmul.f32 %v759_v40, %v753_v16  ;;  %v945_v16 = vld [vmem:[#allocation5 + $0x70] sm:$0xff] }
 0x303   :  { %2175 = vmatpush3.msra.mxu1 %v3097_v53  ;;  %2176 = vmatprep.mubr.msk.f32.mxu1 %vm2778_vm2, %v2779_v21  ;;  %v2541_v19 = vpack.c.bf16 %v946_v18, %v945_v16  ;;  %v1045_v16 = vld [vmem:[#allocation5 + $0xe0] sm:$0xff]  ;;  %v1046_v18 = vld [vmem:[#allocation5 + $0xe8] sm:$0xff] }
 0x304   :  { %v761_v46 = vsub.f32 %v97_v42, %v760_v45  ;;  %2514 = vmatprep.subr.bf16.mxu1 %v2513_v41 }
 0x306   :  { %2177 = vmatmul.mubr.msk.f32.vlgmr.msra.gmra.mrb[8].mxu1 %vm762_vm3, %v761_v46 }
 0x307   :  { %2516 = vmatpush3.bf16.msra.mxu1 %v2513_v41 }
 0x308   :  { %2518 = vmatprep.subr.bf16.mxu1 %v2517_v47 }
 0x30b   :  { %2520 = vmatpush3.bf16.msra.mxu1 %v2517_v47 }
 0x30c   :  { %2522 = vmatprep.subr.bf16.mxu1 %v2521_v50 }
 0x30f   :  { %2524 = vmatpush3.bf16.msra.mxu1 %v2521_v50 }
 0x310   :  { %2526 = vmatprep.subr.bf16.mxu1 %v2525_v55 }
 0x313   :  { %2528 = vmatpush3.bf16.msra.mxu1 %v2525_v55  ;;  %v1035_v55 = vld [vmem:[#allocation5 + $0x90] sm:$0xff] }
 0x314   :  { %2530 = vmatprep.subr.bf16.mxu1 %v2529_v59  ;;  %v2589_v62 = vpack.c.bf16 %v1036_v56, %v1035_v55 }
 0x317   :  { %2532 = vmatpush3.bf16.msra.mxu1 %v2529_v59 }
 0x318   :  { %2534 = vmatprep.subr.bf16.mxu1 %v2533_v63 }
 0x31b   :  { %2536 = vmatpush3.bf16.msra.mxu1 %v2533_v63 }
 0x31c   :  { %2538 = vmatprep.subr.bf16.mxu1 %v2537_v10 }
 0x31f   :  { %2540 = vmatpush3.bf16.msra.mxu1 %v2537_v10  ;;  %v2601_v10 = vpack.c.bf16 %v1042_v9, %v1041_v7 }
 0x320   :  { %2542 = vmatprep.subr.bf16.mxu1 %v2541_v19 }
 0x323   :  { %2544 = vmatpush3.bf16.msra.mxu1 %v2541_v19  ;;  %v2609_v19 = vpack.c.bf16 %v1046_v18, %v1045_v16  ;;  %v929_v16 = vld [vmem:[%s3214_s9] sm:$0x1]  ;;  %s2780_s9 = smov [#allocation7]  }
 0x324   :  { %2586 = vmatprep.subr.bf16.mxu1 %v2585_v34 }
 0x3d5   :  { %v832_v40 = vpop.f32.mrb[6].mxu1 }
 0x3d6   :  { %v912_v41 = vrot.slane %v832_v40, %v3112_v39  ;;  %v2173_v42 = vpop.f32.mrb[7].mxu1 }
 0x3d8   :  { %v914_v43 = vmul.f32 %v3072_v22, %v912_v41  ;;  %v913_v44 = vmul.f32 %v912_v41, %v3076_v24  ;;  %v915_v45 = vmul.f32 %v912_v41, %v3084_v30  ;;  %v916_v46 = vmul.f32 %v3082_v29, %v912_v41  ;;  %v1037_v24 = vld [vmem:[#allocation5 + $0xa0] sm:$0xff]  ;;  %v1038_v30 = vld [vmem:[#allocation5 + $0xa8] sm:$0xff] }
 0x3d9   :  { %v905_v47 = vpop.f32.mrb[8].mxu1  ;;  %v2593_v63 = vpack.c.bf16 %v1038_v30, %v1037_v24 }
 0x3da   :  { %v920_v48 = vrot.slane %v905_v47, %v3112_v39  ;;  %v2178_v49 = vpop.f32.mrb[9].mxu1 }
 0x3dc   :  { %v921_v50 = vadd.f32 %v920_v48, %v913_v44  ;;  %v922_v51 = vadd.f32 %v920_v48, %v914_v43  ;;  %v923_v52 = vadd.f32 %v920_v48, %v915_v45  ;;  %v924_v58 = vadd.f32 %v920_v48, %v916_v46 }
 0x3de   :  { %v925_v59 = vmax.f32 %v921_v50, 0.0  ;;  %v926_v60 = vmax.f32 %v922_v51, 0.0  ;;  %v927_v22 = vmax.f32 %v923_v52, 0.0  ;;  %v928_v29 = vmax.f32 %v924_v58, 0.0 }
 0x3e0   :  { %2211 = vmatprep.mubr.f32.mxu1 %v925_v59  ;;  %2249 = vmatprep.mubr.f32.mxu0 %v925_v59 }
 0x3e1   :  { %2212 = vmatmul.mubr.f32.vlgmr.msra.gmra.mrb[10].mxu1 %v926_v60  ;;  %2250 = vmatmul.mubr.f32.vlgmr.msra.gmra.mrb[10].mxu0 %v926_v60 }
 0x3e2   :  { %2588 = vmatpush3.bf16.msra.mxu1 %v2585_v34  ;;  %2214 = vmatprep.mubr.f32.mxu1 %v927_v22 }
 0x3e3   :  { %2252 = vmatprep.mubr.f32.mxu0 %v927_v22  ;;  %2590 = vmatprep.subr.bf16.mxu1 %v2589_v62 }
 0x3e5   :  { %2215 = vmatmul.mubr.f32.gmra.mrb[12].mxu1 %v928_v29  ;;  %2253 = vmatmul.mubr.f32.gmra.mrb[12].mxu0 %v928_v29 }
 0x3e6   :  { %2592 = vmatpush3.bf16.msra.mxu1 %v2589_v62  ;;  %2301 = vmatprep.mubr.f32.mxu1 %v925_v59 }
 0x3e7   :  { %2594 = vmatprep.subr.bf16.mxu1 %v2593_v63  ;;  %2263 = vmatprep.mubr.msk.f32.mxu0 %vm307_vm1, %v2910_v28  ;;  %v2613_v28 = vpack.c.bf16 %v1048_v25, %v1047_v23  ;;  %v930_v23 = vld [vmem:[%s3215_s10] sm:$0x1]  ;;  %s1756_s10 = sshll.u32 %s2780_s9, 4  ;;  %s1757_s10 = int_to_ptr.vmem [resolvable:$true] %s1756_s10 }
 0x3e8   :  { %s2745_s1 = scalar_lea.vmem %s1757_s10, 512  ;;  %p2750_p3 = scmp.lt.s32.totalorder %s1757_s10, %s1757_s10 }
 0x3e9   :  { %p2746_p2 = scmp.ne.s32.totalorder %s1757_s10, %s2745_s1  ;;  %p2751_p4 = scmp.lt.s32.totalorder %s2745_s1, %s2745_s1 }
 0x3ea   :  { %2596 = vmatpush3.bf16.msra.mxu1 %v2593_v63 }
 0x3eb   :  { %2598 = vmatprep.subr.bf16.mxu1 %v2597_v6  ;;  %p2752_p5 = por %p2751_p4, %p2750_p3 }
 0x3ed   :  { %p2753_p6 = pnand %p2752_p5, %p2746_p2 }
 0x3ee   :  { %2600 = vmatpush3.bf16.msra.mxu1 %v2597_v6 }
 0x3ef   :  { %2602 = vmatprep.subr.bf16.mxu1 %v2601_v10 }
 0x3f2   :  { %2604 = vmatpush3.bf16.msra.mxu1 %v2601_v10 }
 0x3f3   :  { %2606 = vmatprep.subr.bf16.mxu1 %v2605_v15 }
 0x3f6   :  { %2608 = vmatpush3.bf16.msra.mxu1 %v2605_v15 }
 0x3f7   :  { %2610 = vmatprep.subr.bf16.mxu1 %v2609_v19 }
 0x3fa   :  { %2612 = vmatpush3.bf16.msra.mxu1 %v2609_v19 }
 0x3fb   :  { %2614 = vmatprep.subr.bf16.mxu1 %v2613_v28 }
 0x3fe   :  { %2616 = vmatpush3.bf16.msra.mxu1 %v2613_v28 }
 0x401   :  { %2302 = vmatmul.mubr.f32.vlgmr.msra.gmra.mrb[14].mxu1 %v926_v60 }
 0x402   :  { %2304 = vmatprep.mubr.f32.mxu1 %v927_v22 }
 0x405   :  { %2305 = vmatmul.mubr.f32.gmra.mrb[16].mxu1 %v928_v29 }
 0x406   :  { %2315 = vmatprep.mubr.msk.f32.mxu1 %vm307_vm1, %v2975_v2 }
 0x4b4   :  { %v2213_v26 = vpop.f32.mrb[10].mxu1  ;;  %v2251_v27 = vpop.f32.mrb[10].mxu0 }
 0x4b5   :  { %v1013_v31 = vpop.f32.mrb[11].mxu1  ;;  %v1132_v34 = vpop.f32.mrb[11].mxu0 }
 0x4b6   :  { %v2577_v36 = vpack.c.bf16 %v2213_v26, %v1013_v31  ;;  %v2617_v37 = vpack.c.bf16 %v2251_v27, %v1132_v34 }
 0x4b8   :  { %v2216_v40 = vpop.f32.mrb[12].mxu1  ;;  %v2254_v41 = vpop.f32.mrb[12].mxu0  ;;  %2578 = vmatprep.subr.bf16.mxu0 %v2577_v36  ;;  %2618 = vmatprep.subr.bf16.mxu1 %v2617_v37 }
 0x4b9   :  { %v1023_v42 = vpop.f32.mrb[13].mxu1  ;;  %v1142_v43 = vpop.f32.mrb[13].mxu0  ;;  %2580 = vmatpush3.bf16.msra.mxu0 %v2577_v36  ;;  %2620 = vmatpush3.bf16.msra.mxu1 %v2617_v37 }
 0x4ba   :  { %v2581_v44 = vpack.c.bf16 %v2216_v40, %v1023_v42  ;;  %v2621_v45 = vpack.c.bf16 %v2254_v41, %v1142_v43 }
 0x4bc   :  { %2582 = vmatprep.subr.bf16.mxu0 %v2581_v44  ;;  %2622 = vmatprep.subr.bf16.mxu1 %v2621_v45 }
 0x4bd   :  { %2584 = vmatpush3.bf16.msra.mxu0 %v2581_v44  ;;  %2624 = vmatpush3.bf16.msra.mxu1 %v2621_v45 }
 0x4be   :  { %2625 = vmatprep.subr.bf16.mxu0 %v2777_v32  ;;  %2649 = vmatprep.subr.bf16.mxu1 %v2777_v32 }
 0x4c0   :  { %2264 = vmatmul.mubr.msk.f32.vlgmr.msra.gmra.mrb[14].mxu0 %vm307_vm1, %v2948_v54  ;;  %2316 = vmatmul.mubr.msk.f32.vlgmr.msra.gmra.mrb[14].mxu1 %vm307_vm1, %v2984_v3 }
 0x4c1   :  { %2266 = vmatprep.mubr.msk.f32.mxu0 %vm307_vm1, %v2953_v57  ;;  %2318 = vmatprep.mubr.msk.f32.mxu1 %vm307_vm1, %v2989_v4 }
 0x4c2   :  { %2627 = vmatpush3.bf16.msra.mxu0 %v2924_v33  ;;  %2651 = vmatpush3.bf16.msra.mxu1 %v2924_v33 }
 0x4c3   :  { %2628 = vmatprep.subr.bf16.mxu0 %v2777_v32  ;;  %2652 = vmatprep.subr.bf16.mxu1 %v2777_v32 }
 0x4c4   :  { %2267 = vmatmul.mubr.msk.f32.gmra.mrb[16].mxu0 %vm307_vm1, %v2962_v61  ;;  %2319 = vmatmul.mubr.msk.f32.gmra.mrb[16].mxu1 %vm307_vm1, %v2999_v5 }
 0x4c5   :  { %2353 = vmatprep.mubr.msk.f32.mxu0 %vm2778_vm2, %v2779_v21  ;;  %2388 = vmatprep.mubr.msk.f32.mxu1 %vm2778_vm2, %v2779_v21 }
 0x4c6   :  { %2630 = vmatpush3.bf16.msra.mxu0 %v2930_v35  ;;  %2654 = vmatpush3.bf16.msra.mxu1 %v2930_v35 }
 0x4c7   :  { %2631 = vmatprep.subr.bf16.mxu0 %v2777_v32  ;;  %2655 = vmatprep.subr.bf16.mxu1 %v2777_v32 }
 0x4ca   :  { %2633 = vmatpush3.bf16.msra.mxu0 %v2940_v38  ;;  %2657 = vmatpush3.bf16.msra.mxu1 %v2940_v38 }
 0x4cb   :  { %2634 = vmatprep.subr.bf16.mxu0 %v2777_v32  ;;  %2658 = vmatprep.subr.bf16.mxu1 %v2777_v32 }
 0x4ce   :  { %2636 = vmatpush3.bf16.msra.mxu0 %v3015_v8  ;;  %2660 = vmatpush3.bf16.msra.mxu1 %v3015_v8 }
 0x4cf   :  { %2637 = vmatprep.subr.bf16.mxu0 %v2777_v32  ;;  %2661 = vmatprep.subr.bf16.mxu1 %v2777_v32 }
 0x4d2   :  { %2639 = vmatpush3.bf16.msra.mxu0 %v3027_v11  ;;  %2663 = vmatpush3.bf16.msra.mxu1 %v3027_v11 }
 0x4d3   :  { %2640 = vmatprep.subr.bf16.mxu0 %v2777_v32  ;;  %2664 = vmatprep.subr.bf16.mxu1 %v2777_v32 }
 0x4d6   :  { %2642 = vmatpush3.bf16.msra.mxu0 %v3039_v14  ;;  %2666 = vmatpush3.bf16.msra.mxu1 %v3039_v14 }
 0x4d7   :  { %2643 = vmatprep.subr.bf16.mxu0 %v2777_v32  ;;  %2667 = vmatprep.subr.bf16.mxu1 %v2777_v32 }
 0x4da   :  { %2645 = vmatpush3.bf16.msra.mxu0 %v3051_v17  ;;  %2669 = vmatpush3.bf16.msra.mxu1 %v3051_v17 }
 0x4db   :  { %2646 = vmatprep.subr.bf16.mxu0 %v2777_v32  ;;  %2670 = vmatprep.subr.bf16.mxu1 %v2777_v32 }
 0x4de   :  { %2648 = vmatpush3.bf16.msra.mxu0 %v3063_v20  ;;  %2672 = vmatpush3.bf16.msra.mxu1 %v3063_v20 }
 0x4df   :  { %2391 = vmatprep.subr.mxu0 %v2779_v21 }
 0x593   :  { %v2265_v33 = vpop.f32.mrb[14].mxu0  ;;  %v2317_v35 = vpop.f32.mrb[14].mxu1 }
 0x594   :  { %v2673_v38 = vadd.f32 %v2317_v35, %v2265_v33  ;;  %v1217_v54 = vpop.f32.mrb[15].mxu0  ;;  %v1387_v57 = vpop.f32.mrb[15].mxu1 }
 0x595   :  { %v2674_v61 = vadd.f32 %v1387_v57, %v1217_v54 }
 0x596   :  { %v1420_v2 = vmul.f32 %v2673_v38, %v2673_v38 }
 0x597   :  { %v1419_v3 = vmul.f32 %v2674_v61, %v2674_v61  ;;  %v2268_v4 = vpop.f32.mrb[16].mxu0  ;;  %v2320_v5 = vpop.f32.mrb[16].mxu1  ;;  %v1410_v32 = vadd.f32 %v2674_v61, %v2673_v38 }
 0x598   :  { %v2675_v8 = vadd.f32 %v2320_v5, %v2268_v4  ;;  %v1227_v11 = vpop.f32.mrb[17].mxu0  ;;  %v1397_v14 = vpop.f32.mrb[17].mxu1 }
 0x599   :  { %v2676_v17 = vadd.f32 %v1397_v14, %v1227_v11  ;;  %v1423_v46 = vadd.f32 %v1420_v2, %v1419_v3 }
 0x59a   :  { %v1422_v48 = vmul.f32 %v2675_v8, %v2675_v8 }
 0x59b   :  { %v1411_v47 = vadd.f32 %v2676_v17, %v1410_v32  ;;  %v1421_v20 = vmul.f32 %v2676_v17, %v2676_v17 }
 0x59d   :  { %v1412_v49 = vadd.f32 %v2675_v8, %v1411_v47  ;;  %v1424_v50 = vadd.f32 %v1423_v46, %v1421_v20 }
 0x59f   :  { %v1413_v51 = vrot.slane %v1412_v49, 4  ;;  %v1425_v52 = vadd.f32 %v1424_v50, %v1422_v48 }
 0x5a1   :  { %v1414_v55 = vadd.f32 %v1413_v51, %v1412_v49  ;;  %v1426_v56 = vrot.slane %v1425_v52, 4 }
 0x5a3   :  { %v1415_v58 = vrot.slane %v1414_v55, 2  ;;  %v1427_v59 = vadd.f32 %v1426_v56, %v1425_v52 }
 0x5a5   :  { %v1416_v60 = vadd.f32 %v1415_v58, %v1414_v55  ;;  %v1428_v62 = vrot.slane %v1427_v59, 2 }
 0x5a7   :  { %v1417_v22 = vrot.slane %v1416_v60, 1  ;;  %v1429_v24 = vadd.f32 %v1428_v62, %v1427_v59 }
 0x5a9   :  { %v1418_v30 = vadd.f32 %v1417_v22, %v1416_v60  ;;  %v1430_v29 = vrot.slane %v1429_v24, 1 }
 0x5ab   :  { %2354 = vmatmul.mubr.f32.vlgmr.msra.gmra.mrb[18].mxu0 %v1418_v30  ;;  %v1431_v63 = vadd.f32 %v1430_v29, %v1429_v24 }
 0x5ac   :  { %2392 = vmatpush3.msra.mxu0 %v3097_v53  ;;  %2393 = vmatprep.mubr.msk.f32.mxu0 %vm2778_vm2, %v2779_v21 }
 0x5ad   :  { %2389 = vmatmul.mubr.f32.vlgmr.msra.gmra.mrb[18].mxu1 %v1431_v63  ;;  %2396 = vmatprep.subr.mxu0 %v2779_v21 }
 0x67e   :  { %v1498_v0 = vpop.f32.mrb[18].mxu0 }
 0x67f   :  { %v1572_v1 = vmul.f32 0.001953125, %v1498_v0  ;;  %v2355_v6 = vpop.f32.mrb[19].mxu0 }
 0x680   :  { %v1568_v7 = vpop.f32.mrb[18].mxu1 }
 0x681   :  { %v1574_v9 = vmul.f32 %v1572_v1, %v1572_v1  ;;  %v1573_v10 = vmul.f32 0.001953125, %v1568_v7  ;;  %v2390_v12 = vpop.f32.mrb[19].mxu1 }
 0x683   :  { %v1575_v13 = vsub.f32 %v1573_v10, %v1574_v9 }
 0x685   :  { %v1576_v15 = vadd.f32 1e-05, %v1575_v13 }
 0x687   :  { %2699 = vrsqrt.f32 %v1576_v15 }
 0x691   :  { %v2700_v18 = vpop.eup %2699 }
 0x692   :  { %v1578_v19 = vmul.f32 %v2700_v18, %v929_v16 }
 0x694   :  { %2394 = vmatmul.mubr.msk.f32.vlgmr.msra.gmra.mrb[20].mxu0 %vm762_vm3, %v1578_v19  ;;  %v1579_v25 = vmul.f32 %v1578_v19, %v1572_v1 }
 0x695   :  { %2397 = vmatpush3.msra.mxu0 %v3097_v53  ;;  %2398 = vmatprep.mubr.msk.f32.mxu0 %vm2778_vm2, %v2779_v21 }
 0x696   :  { %v1580_v28 = vsub.f32 %v930_v23, %v1579_v25 }
 0x698   :  { %2399 = vmatmul.mubr.msk.f32.vlgmr.msra.gmra.mrb[22].mxu0 %vm762_vm3, %v1580_v28 }
 0x767   :  { %v1650_v26 = vpop.f32.mrb[20].mxu0 }
 0x768   :  { %v1730_v27 = vrot.slane %v1650_v26, %v3112_v39  ;;  %v2395_v31 = vpop.f32.mrb[21].mxu0 }
 0x76a   :  { %v1731_v34 = vmul.f32 %v2674_v61, %v1730_v27  ;;  %v1732_v37 = vmul.f32 %v2673_v38, %v1730_v27  ;;  %v1733_v40 = vmul.f32 %v2676_v17, %v1730_v27  ;;  %v1734_v41 = vmul.f32 %v2675_v8, %v1730_v27 }
 0x76b   :  { %v1723_v36 = vpop.f32.mrb[22].mxu0 }
 0x76c   :  { %v1738_v42 = vrot.slane %v1723_v36, %v3112_v39  ;;  %v2400_v43 = vpop.f32.mrb[23].mxu0 }
 0x76e   :  { %v1739_v53 = vadd.f32 %v1738_v42, %v1731_v34  ;;  %v1740_v44 = vadd.f32 %v1738_v42, %v1732_v37  ;;  %v1741_v21 = vadd.f32 %v1738_v42, %v1733_v40  ;;  %v1742_v45 = vadd.f32 %v1738_v42, %v1734_v41 }
 0x770   :  { %v1743_v33 = vmax.f32 %v1739_v53, 0.0  ;;  %v1744_v35 = vmax.f32 %v1740_v44, 0.0  ;;  %v1745_v54 = vmax.f32 %v1741_v21, 0.0  ;;  %v1746_v57 = vmax.f32 %v1742_v45, 0.0 }
 0x772   :  { %1747 = vst [vmem:[#allocation7] sm:$0xff] %v1743_v33  ;;  %1748 = vst [vmem:[#allocation7 + $0x8] sm:$0xff] %v1744_v35 }
 0x773   :  { %1749 = vst [vmem:[#allocation7 + $0x10] sm:$0xff] %v1745_v54  ;;  %1750 = vst [vmem:[#allocation7 + $0x18] sm:$0xff] %v1746_v57 }
 0x774   :  { %2756 = shalt.err (!%p2753_p6)
}
 0x775   :  { %s2757_s24 = scalar_lea.hbm %s3216_s11, 512 }
 0x776   :  { %p2758_p7 = scmp.ne.s32.totalorder %s3216_s11, %s2757_s24  ;;  %p2761_p8 = scmp.lt.u32.totalorder %s2757_s24, %s3216_s11 }
 0x778   :  { %p2763_p9 = pnand %p2761_p8, %p2758_p7 }
 0x77a   :  { %2766 = shalt.err (!%p2763_p9)
}
 0x77b   :  { %1762 = dma.vmem_to_hbm [thread:$0]  %s1757_s10, 512, %s3216_s11, [#allocation4], %s2774_s27, %s2774_s27, %s2775_s28  }
 0x77c   :  { %2771 = dma.done.wait [#allocation4], 512  }
 0x77d   :  { %2772 = vsyncadd [#allocation4], 4294966784 }
 0x77e   :  { %1766 = vsyncpa [#allocation3], 1 }
 0x77f   :  { %1767 = vsyncpa [#allocation6], 1 }
 0x780   :  { %1768 = vsyncpa [#allocation4], 1 }

</bundles_post_ra>
